<compile_context>
chip_gen: v7x
topology: tpu7x:2x2x1
jax: 0.10.0
libtpu: 0.0.40
codegen_flags: <defaults>
</compile_context>

<pallas_src>
import functools

import jax
import jax.numpy as jnp
from jax.experimental import pallas as pl
from jax.experimental.pallas import tpu as pltpu


def _ce_partial_kernel(logits_ref, labels_ref, out_ref, *, num_classes,
                       chunk_rows, num_chunks, rows_per_tile, valid_pixels,
                       needs_mask, class_mode, unroll):
    """Per-tile partial CE sum: sum_i (logsumexp(x_i) - x_i[y_i]).

    logits_ref : (1, C, r_tile, 128)  -- each class slab dense (rows x 128 lanes)
    labels_ref : (1, r_tile, 128) int32
    out_ref    : (1, 1, 1, 128)       -- lane-wise partial sums for this tile

    The block is processed in register-resident row chunks of `chunk_rows`
    sublanes; m/s/correct and the running row-sum stay in vregs.  Only the
    final sublane reduce (once per grid step) touches the XLU.
    """
    # TODO(synk): nn.CrossEntropyLoss's ignore_index=-100 / out-of-range label
    # handling is not implemented (such labels still contribute their lse and
    # are counted in the mean denominator).
    C = num_classes
    CH = chunk_rows

    def load(c, r0):
        return logits_ref[0, c, pl.ds(r0, CH), :]

    def chunk_loss(r0, lab):
        if class_mode == "cached":
            # Small C: load each class slab once, keep it in vregs for both the
            # max pass and the exp/select pass.
            xs = [load(c, r0).astype(jnp.float32) for c in range(C)]
            m = xs[0]
            for c in range(1, C):
                m = jnp.maximum(m, xs[c])
            s = jnp.exp(xs[0] - m)
            correct = jnp.where(lab == 0, xs[0], 0.0)
            for c in range(1, C):
                s = s + jnp.exp(xs[c] - m)
                correct = jnp.where(lab == c, xs[c], correct)
        elif class_mode == "unrolled":
            # Two passes; the max pass runs in the input dtype (max is exact),
            # a single cast to f32 afterwards.
            m_nat = load(0, r0)
            for c in range(1, C):
                m_nat = jnp.maximum(m_nat, load(c, r0))
            m = m_nat.astype(jnp.float32)
            x0 = load(0, r0).astype(jnp.float32)
            s = jnp.exp(x0 - m)
            correct = jnp.where(lab == 0, x0, 0.0)
            for c in range(1, C):
                xc = load(c, r0).astype(jnp.float32)
                s = s + jnp.exp(xc - m)
                correct = jnp.where(lab == c, xc, correct)
        else:  # "looped": keep code size bounded for large C
            # TODO(synk): for vocab-scale C a classes-on-lanes layout (XLU/MXU
            # lane reduction) beats C elementwise passes; this path only bounds
            # compile time / code size.
            def max_body(c, m_nat):
                return jnp.maximum(m_nat, load(c, r0))
            m = jax.lax.fori_loop(1, C, max_body, load(0, r0)).astype(jnp.float32)

            x0 = load(0, r0).astype(jnp.float32)

            def acc_body(c, carry):
                s, correct = carry
                xc = load(c, r0).astype(jnp.float32)
                return s + jnp.exp(xc - m), jnp.where(lab == c, xc, correct)

            s, correct = jax.lax.fori_loop(
                1, C, acc_body, (jnp.exp(x0 - m), jnp.where(lab == 0, x0, 0.0)))
        return jnp.log(s) + m - correct                       # (CH, 128) f32

    def chunk_body(ci, acc):
        r0 = ci * CH if isinstance(ci, int) else pl.multiple_of(ci * CH, CH)
        lab = labels_ref[0, pl.ds(r0, CH), :]                 # (CH, 128) int32
        loss = chunk_loss(r0, lab)
        if needs_mask:
            # Zero the contribution of padded pixels / out-of-bounds tail rows.
            row = jax.lax.broadcasted_iota(jnp.int32, (CH, 128), 0)
            lane = jax.lax.broadcasted_iota(jnp.int32, (CH, 128), 1)
            pix = (pl.program_id(1) * rows_per_tile + r0 + row) * 128 + lane
            loss = jnp.where(pix < valid_pixels, loss, 0.0)
        return acc + loss                                     # fused row-sum

    acc0 = jnp.zeros((CH, 128), jnp.float32)
    if num_chunks == 1:
        acc = chunk_body(0, acc0)
    else:
        acc = jax.lax.fori_loop(0, num_chunks, chunk_body, acc0, unroll=unroll)

    out_ref[...] = jnp.sum(acc, axis=0, keepdims=True).reshape(1, 1, 1, 128)


def _pick_row_tile(r_total, num_classes, itemsize):
    """Rows-of-128-lanes per tile: ~4 MiB of logits per block (per-step overhead
    <10% of HBM time), always a multiple of 8 (the (8,128) rule) or the full
    extent when the array is tiny, and NEVER an unbounded whole-axis block."""
    if r_total <= 8:
        return r_total                     # full-extent tiny block is allowed
    r_cap = max(8, ((4 << 20) // (num_classes * 128 * itemsize)) // 8 * 8)
    r_up = ((r_total + 7) // 8) * 8
    if r_up <= r_cap:
        return r_up                        # one tile per batch element
    if r_total % 8 == 0:
        # largest multiple-of-8 divisor under the cap, but only if it keeps
        # tiles big (otherwise fall through to a masked tail tile).
        r = r_cap
        while r >= 8:
            if r_total % r == 0 and 2 * r >= r_cap:
                return r
            r -= 8
    return r_cap                           # masked tail tile


def _pick_chunk_rows(r_tile, num_classes, cached, itemsize):
    """Rows per register-resident inner chunk (8-32 sublanes), sized to a rough
    vreg budget and aligned to the packed sublane tile of the input dtype."""
    if r_tile < 8 or r_tile % 8 != 0:
        return r_tile                      # tiny full-extent tile: one chunk
    per_8rows = (num_classes + 5) if cached else 7
    min_ch = 8 * max(1, 4 // max(1, itemsize))   # f32 -> 8, bf16 -> 16
    for ch in (32, 16, 8):
        if ch % min_ch == 0 and r_tile % ch == 0 and (ch // 8) * per_8rows <= 32:
            return ch
    return min_ch if r_tile % min_ch == 0 else 8


def ce_loss(pred, mask):
    """Cross-entropy loss (mean reduction) matching torch.nn.CrossEntropyLoss.

    pred : (B, C, H, W) float logits (no softmax applied)
    mask : (B, 1, H, W) integer class labels
    returns scalar float32 loss
    """
    B, C, H, W = pred.shape
    HW = H * W
    N = B * HW
    itemsize = jnp.dtype(pred.dtype).itemsize

    # Lane-dense spatial layout; pad HW up to a multiple of 128 if needed
    # (padded pixels are masked to zero contribution inside the kernel).
    HW_pad = ((HW + 127) // 128) * 128
    pad = HW_pad - HW
    logits_flat = pred.reshape(B, C, HW)
    # TODO(synk): labels are kept int32; narrowing to int8 (C<=127) would cut
    # label HBM bytes 4x on v5e/v6e but is left out to avoid sub-word layout risk.
    labels_flat = mask.reshape(B, HW).astype(jnp.int32)
    if pad:
        logits_flat = jnp.pad(logits_flat, ((0, 0), (0, 0), (0, pad)))
        labels_flat = jnp.pad(labels_flat, ((0, 0), (0, pad)))
    r_total = HW_pad // 128
    logits = logits_flat.reshape(B, C, r_total, 128)   # keep caller dtype (bf16 ok)
    labels = labels_flat.reshape(B, r_total, 128)

    r_tile = _pick_row_tile(r_total, C, itemsize)
    num_t = -(-r_total // r_tile)

    # v7x has 2 TensorCores: make sure there are >= 2 parallel grid steps.
    if B * num_t < 2 and r_total >= 16:
        r_tile = ((-(-r_total // 2) + 7) // 8) * 8
        num_t = -(-r_total // r_tile)

    needs_mask = (pad != 0) or (r_total % r_tile != 0)

    if C <= 16:
        class_mode = "cached"
    elif C <= 48:
        class_mode = "unrolled"
    else:
        class_mode = "looped"

    chunk_rows = _pick_chunk_rows(r_tile, C, class_mode == "cached", itemsize)
    num_chunks = r_tile // chunk_rows
    if num_chunks <= 8:
        unroll = True
    elif num_chunks % 4 == 0:
        unroll = 4
    elif num_chunks % 2 == 0:
        unroll = 2
    else:
        unroll = 1

    logits_block = C * r_tile * 128 * itemsize
    labels_block = r_tile * 128 * 4
    vmem_limit = int(min(max(3 * (logits_block + labels_block) + (2 << 20),
                             16 << 20), 96 << 20))

    kernel = functools.partial(
        _ce_partial_kernel,
        num_classes=C, chunk_rows=chunk_rows, num_chunks=num_chunks,
        rows_per_tile=r_tile, valid_pixels=HW, needs_mask=needs_mask,
        class_mode=class_mode, unroll=unroll)

    partials = pl.pallas_call(
        kernel,
        out_shape=jax.ShapeDtypeStruct((B, num_t, 1, 128), jnp.float32),
        grid=(B, num_t),
        in_specs=[
            pl.BlockSpec((1, C, r_tile, 128), lambda b, t: (b, 0, t, 0)),
            pl.BlockSpec((1, r_tile, 128), lambda b, t: (b, t, 0)),
        ],
        out_specs=pl.BlockSpec((1, 1, 1, 128), lambda b, t: (b, t, 0, 0)),
        compiler_params=pltpu.CompilerParams(
            # independent per-tile outputs -> both axes shardable across TCs
            dimension_semantics=("parallel", "parallel"),
            vmem_limit_bytes=vmem_limit,
        ),
    )(logits, labels)

    # Tiny final reduction (num_t * 128 floats per batch element) done in XLA.
    # Denominator is B*H*W (matches torch with no ignored labels).
    return jnp.sum(partials) / jnp.float32(N)


if __name__ == "__main__":
    key = jax.random.PRNGKey(0)
    k1, k2 = jax.random.split(key)

    B, C, H, W = 2, 4, 16, 16
    pred = jax.random.normal(k1, (B, C, H, W), dtype=jnp.float32)
    mask = jax.random.randint(k2, (B, 1, H, W), 0, C, dtype=jnp.int32)

    loss = jax.block_until_ready(ce_loss(pred, mask))

    # pure-JAX reference (same semantics as torch CrossEntropyLoss, mean reduction)
    logits = jnp.transpose(pred, (0, 2, 3, 1)).reshape(-1, C)
    labels = mask.reshape(-1)
    log_probs = jax.nn.log_softmax(logits, axis=-1)
    ref = -jnp.mean(jnp.take_along_axis(log_probs, labels[:, None], axis=-1))
    assert jnp.allclose(loss, ref, atol=1e-5, rtol=1e-5), (loss, ref)

    print("KERNEL_OK")
</pallas_src>

<mosaic_0001>
module attributes {stable_mosaic.version = 11 : i64} {
  func.func @_ce_partial_kernel(%arg0: i32, %arg1: i32, %arg2: memref<1x4x2x128xf32, #tpu.memory_space<vmem>>, %arg3: memref<1x2x128xi32, #tpu.memory_space<vmem>>, %arg4: memref<1x1x1x128xf32, #tpu.memory_space<vmem>>) attributes {dimension_semantics = [#tpu.dimension_semantics<parallel>, #tpu.dimension_semantics<parallel>], iteration_bounds = array<i64: 2, 1>, scalar_prefetch = 0 : i64, scratch_operands = 0 : i64, tpu.core_type = #tpu.core_type<tc>, window_params = [{transform_indices = @transform_0, window_bounds = array<i64: 1, 4, 2, 128>}, {transform_indices = @transform_1, window_bounds = array<i64: 1, 2, 128>}, {transform_indices = @transform_2, window_bounds = array<i64: 1, 1, 1, 128>}]} {
    %cst = arith.constant 0.000000e+00 : f32
    %0 = vector.broadcast %cst : f32 to vector<2x128xf32>
    %c0 = arith.constant 0 : index
    %c0_0 = arith.constant 0 : index
    %c0_1 = arith.constant 0 : index
    %1 = vector.load %arg3[%c0, %c0_0, %c0_1] : memref<1x2x128xi32, #tpu.memory_space<vmem>>, vector<1x2x128xi32>
    %2 = vector.shape_cast %1 : vector<1x2x128xi32> to vector<2x128xi32>
    %c0_2 = arith.constant 0 : index
    %c0_3 = arith.constant 0 : index
    %c0_4 = arith.constant 0 : index
    %c0_5 = arith.constant 0 : index
    %3 = vector.load %arg2[%c0_2, %c0_3, %c0_4, %c0_5] : memref<1x4x2x128xf32, #tpu.memory_space<vmem>>, vector<1x1x2x128xf32>
    %4 = vector.shape_cast %3 : vector<1x1x2x128xf32> to vector<2x128xf32>
    %c0_6 = arith.constant 0 : index
    %c1 = arith.constant 1 : index
    %c0_7 = arith.constant 0 : index
    %c0_8 = arith.constant 0 : index
    %5 = vector.load %arg2[%c0_6, %c1, %c0_7, %c0_8] : memref<1x4x2x128xf32, #tpu.memory_space<vmem>>, vector<1x1x2x128xf32>
    %6 = vector.shape_cast %5 : vector<1x1x2x128xf32> to vector<2x128xf32>
    %c0_9 = arith.constant 0 : index
    %c2 = arith.constant 2 : index
    %c0_10 = arith.constant 0 : index
    %c0_11 = arith.constant 0 : index
    %7 = vector.load %arg2[%c0_9, %c2, %c0_10, %c0_11] : memref<1x4x2x128xf32, #tpu.memory_space<vmem>>, vector<1x1x2x128xf32>
    %8 = vector.shape_cast %7 : vector<1x1x2x128xf32> to vector<2x128xf32>
    %c0_12 = arith.constant 0 : index
    %c3 = arith.constant 3 : index
    %c0_13 = arith.constant 0 : index
    %c0_14 = arith.constant 0 : index
    %9 = vector.load %arg2[%c0_12, %c3, %c0_13, %c0_14] : memref<1x4x2x128xf32, #tpu.memory_space<vmem>>, vector<1x1x2x128xf32>
    %10 = vector.shape_cast %9 : vector<1x1x2x128xf32> to vector<2x128xf32>
    %11 = arith.maximumf %4, %6 : vector<2x128xf32>
    %12 = arith.maximumf %11, %8 : vector<2x128xf32>
    %13 = arith.maximumf %12, %10 : vector<2x128xf32>
    %14 = arith.subf %4, %13 : vector<2x128xf32>
    %15 = math.exp %14 : vector<2x128xf32>
    %c0_i32 = arith.constant 0 : i32
    %16 = vector.broadcast %c0_i32 : i32 to vector<2x128xi32>
    %17 = arith.cmpi eq, %2, %16 : vector<2x128xi32>
    %cst_15 = arith.constant 0.000000e+00 : f32
    %18 = vector.broadcast %cst_15 : f32 to vector<2x128xf32>
    %19 = arith.select %17, %4, %18 : vector<2x128xi1>, vector<2x128xf32>
    %20 = arith.subf %6, %13 : vector<2x128xf32>
    %21 = math.exp %20 : vector<2x128xf32>
    %22 = arith.addf %15, %21 : vector<2x128xf32>
    %c1_i32 = arith.constant 1 : i32
    %23 = vector.broadcast %c1_i32 : i32 to vector<2x128xi32>
    %24 = arith.cmpi eq, %2, %23 : vector<2x128xi32>
    %25 = arith.select %24, %6, %19 : vector<2x128xi1>, vector<2x128xf32>
    %26 = arith.subf %8, %13 : vector<2x128xf32>
    %27 = math.exp %26 : vector<2x128xf32>
    %28 = arith.addf %22, %27 : vector<2x128xf32>
    %c2_i32 = arith.constant 2 : i32
    %29 = vector.broadcast %c2_i32 : i32 to vector<2x128xi32>
    %30 = arith.cmpi eq, %2, %29 : vector<2x128xi32>
    %31 = arith.select %30, %8, %25 : vector<2x128xi1>, vector<2x128xf32>
    %32 = arith.subf %10, %13 : vector<2x128xf32>
    %33 = math.exp %32 : vector<2x128xf32>
    %34 = arith.addf %28, %33 : vector<2x128xf32>
    %c3_i32 = arith.constant 3 : i32
    %35 = vector.broadcast %c3_i32 : i32 to vector<2x128xi32>
    %36 = arith.cmpi eq, %2, %35 : vector<2x128xi32>
    %37 = arith.select %36, %10, %31 : vector<2x128xi1>, vector<2x128xf32>
    %38 = math.log %34 : vector<2x128xf32>
    %39 = arith.addf %38, %13 : vector<2x128xf32>
    %40 = arith.subf %39, %37 : vector<2x128xf32>
    %41 = arith.addf %0, %40 : vector<2x128xf32>
    %cst_16 = arith.constant dense<0.000000e+00> : vector<128xf32>
    %42 = vector.multi_reduction <add>, %41, %cst_16 [0] : vector<2x128xf32> to vector<128xf32>
    %43 = vector.shape_cast %42 : vector<128xf32> to vector<1x128xf32>
    %44 = vector.shape_cast %43 : vector<1x128xf32> to vector<1x1x1x128xf32>
    %c0_17 = arith.constant 0 : index
    %c0_18 = arith.constant 0 : index
    %c0_19 = arith.constant 0 : index
    %c0_20 = arith.constant 0 : index
    %45 = vector.load %arg4[%c0_17, %c0_18, %c0_19, %c0_20] : memref<1x1x1x128xf32, #tpu.memory_space<vmem>>, vector<1x1x1x128xf32>
    tpu.vector_store %arg4[%c0_17, %c0_18, %c0_19, %c0_20], %44 {strides = array<i32>} : memref<1x1x1x128xf32, #tpu.memory_space<vmem>>, vector<1x1x1x128xf32>,
    return
  }
  func.func @transform_0(%arg0: i32, %arg1: i32) -> (i32, i32, i32, i32) {
    %c0_i32 = arith.constant 0 : i32
    %c0_i32_0 = arith.constant 0 : i32
    %c0_i32_1 = arith.constant 0 : i32
    return %arg0, %c0_i32, %arg1, %c0_i32_0 : i32, i32, i32, i32
  }
  func.func @transform_1(%arg0: i32, %arg1: i32) -> (i32, i32, i32) {
    %c0_i32 = arith.constant 0 : i32
    %c0_i32_0 = arith.constant 0 : i32
    return %arg0, %arg1, %c0_i32 : i32, i32, i32
  }
  func.func @transform_2(%arg0: i32, %arg1: i32) -> (i32, i32, i32, i32) {
    %c0_i32 = arith.constant 0 : i32
    %c0_i32_0 = arith.constant 0 : i32
    %c0_i32_1 = arith.constant 0 : i32
    return %arg0, %arg1, %c0_i32, %c0_i32_0 : i32, i32, i32, i32
  }
}

</mosaic_0001>

<bundles_post_ra>
// kernel: tpu_custom_call.1
= control target key start
LH: loop header
LB: loop body
LE: loop exit
PB: predicated region body
PF: predicated region fallthrough
CT: control target
= control target key end

     0   :  { %7 = vsyncpa [#allocation3], 0  ;;  %s863_s0 = inlined_call_operand.hbm [shape: f32[2,4,2,128], index: 0, kind: input, shape index: {}]   ;;  %s864_s1 = inlined_call_operand.hbm [shape: s32[2,2,128], index: 1, kind: input, shape index: {}]   ;;  %s865_s2 = inlined_call_operand.hbm [shape: f32[2,1,1,128], index: 2, kind: output, shape index: {}]  }
   0x1   :  { %9 = vsyncpa [#allocation3 + $0x1], 0 }
   0x2   :  { %10 = vsyncpa [#allocation6], 0 }
   0x3   :  { %12 = vsyncpa [#allocation6 + $0x1], 0 }
   0x4   :  { %13 = vsyncpa [#allocation4], 0 }
   0x5   :  { %15 = vsyncpa [#allocation4 + $0x1], 0  ;;  %s647_s9 = smov 0   ;;  %s649_s10 = smov 0  }
   0x6   :  { %s651_s11 = smov 0   ;;  %s653_s12 = smov 0  }
   0x7   :  { %s655_s13 = smov 0   ;;  %s657_s14 = smov 0  }
   0x8 LB: > { %s381_s15 = sadd.s32 4294967295, %s625_s14   ;;  %s382_s16 = sadd.s32 4294967294, %s625_s14   ;;  %s625_s14 = sphi %s657_s14, %s21_s14   ;;  %s621_s13 = sphi %s655_s13, %s884_s13   ;;  %s617_s12 = sphi %s653_s12, %s883_s12   ;;  %s613_s11 = sphi %s651_s11, %s882_s11   ;;  %s609_s10 = sphi %s649_s10, %s881_s10   ;;  %s605_s9 = sphi %s647_s9, %s880_s9  }
   0x9   : > { %s33_s17 = sadd.s32 1, %s621_s13  ;;  %s42_s18 = sadd.s32 1, %s613_s11 }
   0xa   : > { %p35_p0 = scmp.ge.s32.totalorder %s33_s17, 2  ;;  %p49_p1 = scmp.ne.s32.totalorder %s613_s11, %s609_s10 }
   0xb   : > { %p50_p2 = scmp.eq.s32.totalorder %s625_s14, 0  ;;  %p55_p3 = scmp.ne.s32.totalorder %s609_s10, %s605_s9 }
   0xc   : > { %s886_s17 = smov (%p35_p0, %s33_s17), 0  ;;  %p56_p5 = scmp.eq.s32.totalorder %s381_s15, 0 }
   0xd   : > { %p688_p4 = por %p50_p2, %p49_p1  ;;  %s37_s20 = ssub.s32 %s621_s13, %s886_s17 }
   0xe   : > { %p109_p6 = scmp.eq.s32.totalorder %s381_s15, 1  ;;  %p40_p7 = scmp.eq.s32.totalorder %s37_s20, 0 }
   0xf   : > { %p694_p8 = por %p56_p5, %p55_p3  ;;  %p115_p10 = scmp.eq.s32.totalorder %s382_s16, 1 }
  0x10   : > { %p698_p9 = por %p109_p6, %p49_p1  ;;  %p417_p13 = scmp.lt.s32.totalorder %s625_s14, 2 }
  0x11   : > { %s869_s21 = scalar_select %p694_p8, 1, 0 }
  0x12   : > { %s870_s22 = scalar_select %p698_p9, 1, 0 }
  0x13   : > { %s703_s23 = scalar_select %p40_p7, %s613_s11, %s42_s18  }
  0x14   : > { %p705_p11 = por %p115_p10, %p55_p3  ;;  %s712_s25 = sand.u32 1, %s613_s11  }
  0x15   : > { %s385_s26 = sshll.u32 %s712_s25, 3  ;;  %s399_s27 = sshll.u32 %s621_s13, 7 }
  0x16   : > { %s871_s24 = scalar_select %p705_p11, 1, 0 }
  0x17   : > { %s719_s30 = scalar_lea.hbm %s863_s0, %s399_s27  ;;  %s139_s3 = scalar_lea.vmem [#allocation2], %s385_s26 }
  0x18   : > { %s147_s4 = sshll.u32 %s139_s3, 4  ;;  %p725_p0 = pnand %p417_p13, %p688_p4  ;;  %s721_s4 = int_to_ptr.vmem [resolvable:$true] %s147_s4 }
  0x19   : > { %s136_s6 = scalar_lea.sflag [#allocation3], %s712_s25  ;;  %s479_s7 = scalar_lea.hbm %s719_s30, 128 }
  0x1a   : > { %p480_p2 = scmp.ne.s32.totalorder %s719_s30, %s479_s7  ;;  %p481_p3 = pneg %p725_p0 }
  0x1b   : > { %s484_s16 = scalar_lea.hbm %s863_s0, 256  ;;  %p485_p4 = scmp.lt.u32.totalorder %s719_s30, %s863_s0 }
  0x1c   : > { %p482_p5 = pnand %p481_p3, %p480_p2  ;;  %p486_p7 = scmp.lt.u32.totalorder %s484_s16, %s479_s7 }
  0x1d   : > { %p488_p13 = scmp.lt.u32.totalorder %s479_s7, %s719_s30 }
  0x1e   : > { %p483_p6 = pneg %p482_p5  ;;  %p487_p10 = por %p486_p7, %p485_p4 }
  0x20   : > { %p489_p12 = por %p488_p13, %p487_p10 }
  0x22   : > { %p490_p1 = pnand %p489_p12, %p483_p6 }
  0x24   : > { %493 = shalt.err (!%p490_p1)
}
  0x25   : > { %s494_s20 = scalar_lea.vmem %s721_s4, 128  ;;  %s627_s26 = smov [#allocation2]  }
  0x26   : > { %p495_p2 = scmp.ne.s32.totalorder %s721_s4, %s494_s20  ;;  %s499_s27 = sshll.u32 %s627_s26, 4  ;;  %s500_s27 = int_to_ptr.vmem [resolvable:$false] %s499_s27 }
  0x27   : > { %s501_s28 = scalar_lea.vmem %s500_s27, 256  ;;  %p502_p9 = scmp.lt.s32.totalorder %s721_s4, %s500_s27 }
  0x28   : > { %p497_p5 = pnand %p495_p2, %p481_p3  ;;  %p503_p4 = scmp.lt.s32.totalorder %s501_s28, %s494_s20 }
  0x2a   : > { %p498_p11 = pneg %p497_p5  ;;  %p504_p7 = por %p503_p4, %p502_p9 }
  0x2c   : > { %p505_p10 = pnand %p504_p7, %p498_p11 }
  0x2e   : > { %508 = shalt.err (!%p505_p10)
}
  0x2f   : > { %s628_s29 = smov 32   ;;  %s629_s3 = smov 2  }
  0x30   : > { %409 = dma.hbm_to_vmem [thread:$0]  (!%p725_p0), %s719_s30, 128, %s721_s4, %s136_s6, %s628_s29, %s628_s29, %s629_s3  }
  0x31   : > { %p174_p12 = scmp.lt.s32.totalorder %s625_s14, 3  ;;  %s388_s7 = sshll.u32 %s712_s25, 1 }
  0x32   : > { %s389_s8 = sshll.u32 %s621_s13, 5  ;;  %p873_p9 = scmp.ge.s32.totalorder %s625_s14, 1 }
  0x33   : > { %s770_s19 = scalar_lea.hbm %s864_s1, %s389_s8  ;;  %s161_s20 = scalar_lea.vmem [#allocation5], %s388_s7 }
  0x34   : > { %p763_p11 = pnand %p873_p9, %p174_p12  ;;  %s169_s26 = sshll.u32 %s161_s20, 4  ;;  %s170_s26 = int_to_ptr.vmem [resolvable:$true] %s169_s26 }
  0x35   : > { %s158_s30 = scalar_lea.sflag [#allocation6], %s712_s25  ;;  %s509_s4 = scalar_lea.hbm %s770_s19, 32 }
  0x36   : > { %s874_s15 = scalar_select %p763_p11, 1, 0 }
  0x37   : > { %p510_p1 = scmp.ne.s32.totalorder %s770_s19, %s509_s4  ;;  %s514_s28 = scalar_lea.hbm %s864_s1, 64 }
  0x38   : > { %p515_p2 = scmp.lt.u32.totalorder %s770_s19, %s864_s1  ;;  %p516_p5 = scmp.lt.u32.totalorder %s514_s28, %s509_s4 }
  0x39   : > { %p512_p6 = pnand %p510_p1, %p481_p3  ;;  %p518_p7 = scmp.lt.u32.totalorder %s509_s4, %s770_s19 }
  0x3a   : > { %p517_p4 = por %p516_p5, %p515_p2 }
  0x3b   : > { %p513_p13 = pneg %p512_p6 }
  0x3c   : > { %p519_p10 = por %p518_p7, %p517_p4 }
  0x3e   : > { %p520_p12 = pnand %p519_p10, %p513_p13 }
  0x40   : > { %523 = shalt.err (!%p520_p12)
}
  0x41   : > { %s524_s25 = scalar_lea.vmem %s170_s26, 32  ;;  %s630_s7 = smov [#allocation5]  }
  0x42   : > { %p525_p9 = scmp.ne.s32.totalorder %s170_s26, %s524_s25  ;;  %s529_s8 = sshll.u32 %s630_s7, 4  ;;  %s530_s8 = int_to_ptr.vmem [resolvable:$false] %s529_s8 }
  0x43   : > { %s531_s16 = scalar_lea.vmem %s530_s8, 64  ;;  %p532_p8 = scmp.lt.s32.totalorder %s170_s26, %s530_s8 }
  0x44   : > { %p527_p1 = pnand %p525_p9, %p481_p3  ;;  %p533_p11 = scmp.lt.s32.totalorder %s531_s16, %s524_s25 }
  0x46   : > { %p528_p6 = pneg %p527_p1  ;;  %p534_p2 = por %p533_p11, %p532_p8 }
  0x48   : > { %p535_p5 = pnand %p534_p2, %p528_p6 }
  0x4a   : > { %538 = shalt.err (!%p535_p5)
}
  0x4b   : > { %412 = dma.hbm_to_vmem [thread:$0]  (!%p725_p0), %s770_s19, 32, %s170_s26, %s158_s30  }
  0x4c   : > { %p875_p13 = scmp.ne.s32.totalorder %s874_s15, 0 }
  0x4d   : > { %s795_s18 = sand.u32 (!%p875_p13), 1, %s609_s10   ;;  %p876_p3 = scmp.ne.s32.totalorder (!%p875_p13), %s869_s21, 0 }
  0x4e   : > { %178 = sbr.rel (%p875_p13) target bundleno = 162 (0xa2), region = 28  ;;  %s391_s20 = sshll.u32 (!%p875_p13), %s795_s18, 3 }
  0x4f   : > { %s181_s4 = scalar_lea.sflag (!%p875_p13), [#allocation3], %s795_s18  ;;  %s184_s6 = scalar_lea.vmem (!%p875_p13), [#allocation2], %s391_s20 }
  0x55   : > { %592 = dma.done.wait (%p876_p3), %s181_s4, 128  }
  0x56   : > { %594 = vsyncadd (%p876_p3), %s181_s4, 4294967168  ;;  %s392_s5 = sshll.u32 %s795_s18, 1  ;;  %s190_s15 = scalar_lea.sflag [#allocation6], %s795_s18 }
  0x57   : > { %s193_s19 = scalar_lea.vmem [#allocation5], %s392_s5 }
  0x58   : > { %596 = dma.done.wait (%p876_p3), %s190_s15, 32  }
  0x59   : > { %598 = vsyncadd (%p876_p3), %s190_s15, 4294967264  ;;  %v219_v0 = vld [vmem:[%s184_s6] sm:$0x3]  ;;  %v393_v1 = vld [vmem:[%s184_s6 + $0x2] sm:$0x3]  ;;  %vm257_vm4 = vcmask 1041408  }
  0x5a   : > { %v394_v2 = vld [vmem:[%s184_s6 + $0x4] sm:$0x3]  ;;  %v226_v3 = vmax.f32 %v219_v0, %v393_v1  ;;  %v395_v4 = vld [vmem:[%s184_s6 + $0x6] sm:$0x3]  ;;  %v218_v21 = vld [vmem:[%s193_s19] sm:$0x3] }
  0x5b   : > { %vm232_vm0 = vcmp.eq.s32.totalorder %v218_v21, 0  ;;  %vm238_vm1 = vcmp.eq.s32.totalorder %v218_v21, 1  ;;  %vm244_vm2 = vcmp.eq.s32.totalorder %v218_v21, 2  ;;  %vm250_vm3 = vcmp.eq.s32.totalorder %v218_v21, 3  ;;  %s217_s21 = scalar_lea.vmem [#allocation7], %s795_s18  ;;  %s396_s30 = sshll.u32 %s617_s12, 4 }
  0x5c   : > { %v227_v5 = vmax.f32 %v226_v3, %v394_v2  ;;  %v233_v23 = vsel %vm232_vm0, %v219_v0, 0.0  ;;  %s280_s26 = sshll.u32 %s217_s21, 4  ;;  %s816_s29 = scalar_lea.hbm %s865_s2, %s396_s30  ;;  %s811_s26 = int_to_ptr.vmem [resolvable:$true] %s280_s26 }
  0x5d   : > { %v239_v24 = vsel %vm238_vm1, %v393_v1, %v233_v23  ;;  %s267_s3 = scalar_lea.sflag [#allocation4], %s795_s18  ;;  %s539_s25 = scalar_lea.vmem %s811_s26, 16 }
  0x5e   : > { %v228_v6 = vmax.f32 %v227_v5, %v395_v4  ;;  %v245_v25 = vsel %vm244_vm2, %v394_v2, %v239_v24  ;;  %p540_p8 = scmp.ne.s32.totalorder %s811_s26, %s539_s25  ;;  %p877_p0 = scmp.ne.s32.totalorder %s870_s22, 0 }
  0x5f   : > { %v251_v28 = vsel %vm250_vm3, %v395_v4, %v245_v25  ;;  %s631_s12 = smov [#allocation7]  }
  0x60   : > { %v229_v7 = vsub.f32 %v219_v0, %v228_v6  ;;  %v234_v8 = vsub.f32 %v393_v1, %v228_v6  ;;  %v240_v9 = vsub.f32 %v394_v2, %v228_v6  ;;  %v246_v10 = vsub.f32 %v395_v4, %v228_v6  ;;  %p541_p11 = pnand %p540_p8, %p877_p0  ;;  %s543_s7 = sshll.u32 %s631_s12, 4  ;;  %s544_s7 = int_to_ptr.vmem [resolvable:$false] %s543_s7 }
  0x61   : > { %s545_s8 = scalar_lea.vmem %s544_s7, 32  ;;  %p546_p7 = scmp.lt.s32.totalorder %s811_s26, %s544_s7 }
  0x62   : > { %v230_v11 = vmul.f32 1.442695, %v229_v7  ;;  %v235_v12 = vmul.f32 1.442695, %v234_v8  ;;  %v241_v13 = vmul.f32 1.442695, %v240_v9  ;;  %p542_p4 = pneg %p541_p11  ;;  %p547_p10 = scmp.lt.s32.totalorder %s545_s8, %s539_s25 }
  0x63   : > { %v247_v14 = vmul.f32 1.442695, %v246_v10 }
  0x64   : > { %469 = vpow2.f32 %v230_v11  ;;  %p548_p12 = por %p547_p10, %p546_p7 }
  0x65   : > { %471 = vpow2.f32 %v235_v12 }
  0x66   : > { %473 = vpow2.f32 %v241_v13  ;;  %p549_p9 = pnand %p548_p12, %p542_p4 }
  0x67   : > { %475 = vpow2.f32 %v247_v14 }
  0x6e   : > { %v470_v15 = vpop.eup %469 }
  0x6f   : > { %v472_v16 = vpop.eup %471 }
  0x70   : > { %v474_v17 = vpop.eup %473  ;;  %v237_v18 = vadd.f32 %v472_v16, %v470_v15 }
  0x71   : > { %v476_v19 = vpop.eup %475 }
  0x72   : > { %v243_v20 = vadd.f32 %v474_v17, %v237_v18 }
  0x74   : > { %v249_v22 = vadd.f32 %v476_v19, %v243_v20 }
  0x76   : > { %477 = vlog2.f32 %v249_v22 }
  0x80   : > { %v478_v26 = vpop.eup %477 }
  0x81   : > { %v253_v27 = vmul.f32 0.6931472, %v478_v26 }
  0x83   : > { %v254_v29 = vadd.f32 %v253_v27, %v228_v6 }
  0x85   : > { %v255_v30 = vsub.f32 %v254_v29, %v251_v28 }
  0x87   : > { %v258_v31 = vsel %vm257_vm4, %v255_v30, 0.0 }
  0x88   : > { %v259_v32 = vrot.slane %v258_v31, 4 }
  0x8a   : > { %v260_v33 = vadd.f32 %v259_v32, %v258_v31 }
  0x8c   : > { %v261_v34 = vrot.slane %v260_v33, 2 }
  0x8e   : > { %v262_v35 = vadd.f32 %v261_v34, %v260_v33 }
  0x90   : > { %v263_v36 = vrot.slane %v262_v35, 1 }
  0x92   : > { %v264_v37 = vadd.f32 %v263_v36, %v262_v35 }
  0x94   : > { %265 = vst [vmem:[%s217_s21] sm:$0x1] %v264_v37 }
  0x95   : > { %552 = shalt.err (!%p549_p9)
}
  0x96   : > { %s553_s16 = scalar_lea.hbm %s816_s29, 16  ;;  %s557_s4 = scalar_lea.hbm %s865_s2, 32 }
  0x97   : > { %p554_p1 = scmp.ne.s32.totalorder %s816_s29, %s553_s16  ;;  %p558_p5 = scmp.lt.u32.totalorder %s816_s29, %s865_s2 }
  0x98   : > { %p559_p13 = scmp.lt.u32.totalorder %s557_s4, %s553_s16  ;;  %p561_p8 = scmp.lt.u32.totalorder %s553_s16, %s816_s29 }
  0x99   : > { %p555_p6 = pnand %p554_p1, %p877_p0 }
  0x9a   : > { %p560_p3 = por %p559_p13, %p558_p5 }
  0x9b   : > { %p556_p2 = pneg %p555_p6 }
  0x9c   : > { %p562_p11 = por %p561_p8, %p560_p3 }
  0x9e   : > { %p563_p4 = pnand %p562_p11, %p556_p2 }
  0xa0   : > { %566 = shalt.err (!%p563_p4)
}
  0xa1   : > { %404 = dma.vmem_to_hbm [thread:$0]  (%p877_p0), %s811_s26, 16, %s816_s29, %s267_s3  }
  0xa2 PF: > { %s292_s15 = sand.u32 1, %s605_s9   ;;  %p878_p7 = scmp.ne.s32.totalorder %s871_s24, 0 }
  0xa3   : > { %p879_p10 = scmp.ge.s32.totalorder %s625_s14, 2  ;;  %s293_s19 = scalar_lea.sflag [#allocation4], %s292_s15 }
  0xa5   : > { %p414_p12 = pnand %p879_p10, %p878_p7 }
  0xa7   : > { %600 = dma.done.wait (!%p414_p12), %s293_s19, 16  }
  0xa8   : > { %602 = vsyncadd (!%p414_p12), %s293_s19, 4294967280  ;;  %s21_s14 = sadd.s32 1, %s625_s14   ;;  %s880_s9 = smov %s609_s10 }
  0xa9   : > { %p18_p9 = scmp.ge.s32.totalorder %s21_s14, 4   ;;  %s881_s10 = smov %s613_s11 }
  0xaa   : > { %s882_s11 = smov %s703_s23  ;;  %s883_s12 = smov %s621_s13 }
  0xab   : > { %s884_s13 = smov %s886_s17  ;;  %20 = sbr.rel (!%p18_p9) target bundleno = 8 (0x8), region = 89 }
  0xb2   :  { %297 = vsyncpa [#allocation3], 1 }
  0xb3   :  { %299 = vsyncpa [#allocation3 + $0x1], 1 }
  0xb4   :  { %300 = vsyncpa [#allocation6], 1 }
  0xb5   :  { %302 = vsyncpa [#allocation6 + $0x1], 1 }
  0xb6   :  { %303 = vsyncpa [#allocation4], 1 }
  0xb7   :  { %305 = vsyncpa [#allocation4 + $0x1], 1 }

</bundles_post_ra>
